<compile_context>
chip_gen: v6e
topology: v6e:2x2x1
jax: 0.10.0
libtpu: 0.0.40
codegen_flags: <defaults>
</compile_context>

<pallas_src>
import jax
import jax.numpy as jnp
import numpy as np
from jax.experimental import pallas as pl
from jax.experimental.pallas import tpu as pltpu

_LANE = 128
_LOG_EPS = float(np.log(1e-10))  # torch gate floor: log(I + 1e-10) >= log(1e-10)


def gated_fusion_kernel(alpha_ref,      # SMEM (2,)   [alpha_flow, alpha_pkt]
                        flow_ref,       # VMEM (tb, Fd)   original input dtype
                        pkt_ref,        # VMEM (tb, Pd)   original input dtype
                        wsf_ref,        # VMEM (1, Fd)    f32 similarity weight (row)
                        wsp_ref,        # VMEM (1, Pd)    f32 similarity weight (row)
                        wff_ref,        # VMEM (Fd, H)    bf16 fusion weight, flow rows
                        wfp_ref,        # VMEM (Pd, H)    bf16 fusion weight, pkt rows
                        bfus_ref,       # VMEM (1, H)     f32 bias
                        out_ref):       # VMEM (tb, H)    f32
    # Gating math in f32 (v5e has no bf16 VPU/EUP); matmuls in bf16 on the MXU.
    flow = flow_ref[...].astype(jnp.float32)
    pkt = pkt_ref[...].astype(jnp.float32)

    # Similarity logits [tb, 1]: VPU broadcast-mul + XLU row-reduce (a [tb,Fd]@[Fd,1]
    # matmul would be 1/128-lane MXU work and would contend with the fused matmul).
    s_f = jnp.sum(flow * wsf_ref[...], axis=-1, keepdims=True)
    s_p = jnp.sum(pkt * wsp_ref[...], axis=-1, keepdims=True)

    # Stable 2-way log-softmax; clamp at log(1e-10) to match torch's log(I + 1e-10)
    # saturation in the tails.
    m = jnp.maximum(s_f, s_p)
    lse = m + jnp.log(jnp.exp(s_f - m) + jnp.exp(s_p - m))
    log_i_f = jnp.maximum(s_f - lse, _LOG_EPS)
    log_i_p = jnp.maximum(s_p - lse, _LOG_EPS)

    a_f = alpha_ref[0]
    a_p = alpha_ref[1]
    flow_adj = flow * (1.0 + a_f * log_i_f)
    pkt_adj = pkt * (1.0 + a_p * log_i_p)

    # torch: cat([flow_adj, pkt_adj]) @ W_fus.T + b  ==  split matmul. bf16 MXU inputs,
    # f32 accumulation.
    fused = jnp.dot(flow_adj.astype(wff_ref.dtype), wff_ref[...],
                    preferred_element_type=jnp.float32)
    fused = fused + jnp.dot(pkt_adj.astype(wfp_ref.dtype), wfp_ref[...],
                            preferred_element_type=jnp.float32)
    fused = fused + bfus_ref[...]
    out_ref[...] = fused.astype(out_ref.dtype)


def _round_up(x, m):
    return (x + m - 1) // m * m


def _cdiv(a, b):
    return (a + b - 1) // b


def _vmem_capacity_bytes():
    try:
        return int(pltpu.get_tpu_info().vmem_capacity_bytes)
    except Exception:
        return 64 << 20  # conservative fallback (v7x per-core VMEM)


def _vmem_buf_bytes(rows, cols, itemsize):
    # VMEM footprint of one buffer (sublane x lane tile padding; bf16 packs 16 sublanes).
    sublane = max(32 // itemsize, 8)
    return _round_up(max(rows, 1), sublane) * _round_up(max(cols, 1), _LANE) * itemsize


def prepare_params(params, flow_dim):
    """One-time weight transpose/split/cast, hoisted out of the per-call path."""
    w_fus = params["fusion_fc.weight"]                                  # (H, Fd+Pd)
    return {
        "alphas": jnp.stack([params["alpha_flow"],
                             params["alpha_pkt"]]).astype(jnp.float32),  # (2,)
        "w_sf": params["similarity_fc_flow.weight"].astype(jnp.float32),  # (1, Fd)
        "w_sp": params["similarity_fc_pkt.weight"].astype(jnp.float32),   # (1, Pd)
        "W_fus_flow": jnp.asarray(w_fus[:, :flow_dim].T, jnp.bfloat16),   # (Fd, H)
        "W_fus_pkt": jnp.asarray(w_fus[:, flow_dim:].T, jnp.bfloat16),    # (Pd, H)
        "b_fus": params["fusion_fc.bias"].astype(jnp.float32).reshape(1, -1),  # (1, H)
    }


def gated_activation_fusion(flow, pkt, prepared, *, max_tb=1024):
    B, Fd = flow.shape
    B2, Pd = pkt.shape
    assert B2 == B
    H = prepared["b_fus"].shape[-1]

    # Only the batch dim is padded (sublane alignment); feature/hidden dims stay
    # unpadded — full-dim blocks satisfy the (8,128) rule and Mosaic lane-pads the VMEM
    # tiles for free, so per-tile DMA bytes equal the logical activation bytes.
    B_p = _round_up(B, 8)
    if B_p != B:
        flow = jnp.pad(flow, ((0, B_p - B), (0, 0)))
        pkt = jnp.pad(pkt, ((0, B_p - B), (0, 0)))

    # Generation-aware VMEM budget: ~112 MiB usable on v5e/v6e (128 MiB), ~48 MiB on v7x.
    cap = _vmem_capacity_bytes()
    limit_cap = max(cap - (16 << 20), 32 << 20)
    budget = max(limit_cap - (12 << 20), 16 << 20)

    f_is = flow.dtype.itemsize
    p_is = pkt.dtype.itemsize
    # Resident (constant index_map) weights are still allocated double-buffered by the
    # auto-pipeline (only fetched once at runtime).
    # TODO(synk): pipeline_mode=pl.Buffered(1) on the weight specs would halve this.
    weight_bytes = 2 * (_vmem_buf_bytes(Fd, H, 2) + _vmem_buf_bytes(Pd, H, 2)
                        + _vmem_buf_bytes(1, Fd, 4) + _vmem_buf_bytes(1, Pd, 4)
                        + _vmem_buf_bytes(1, H, 4))
    rFd, rPd, rH = _round_up(Fd, _LANE), _round_up(Pd, _LANE), _round_up(H, _LANE)
    # Per batch row: double-buffered in/out tiles + f32 compute temporaries.
    per_row = 2 * (rFd * f_is + rPd * p_is + rH * 4) + (2 * (rFd + rPd) + 2 * rH) * 4

    avail = max(budget - weight_bytes, per_row * 8)
    tb = max(avail // per_row, 8)
    # Large batches get >=4 grid steps (DMA/compute overlap, both v7x TCs busy);
    # big tiles align to the 256-wide MXU; never exceed the padded batch.
    tb = min(tb, max_tb, _round_up(_cdiv(B_p, 4), 256), B_p)
    tb = (tb // 256 * 256) if tb >= 256 else max(tb // 8 * 8, 8)
    tb = int(tb)

    grid = (_cdiv(B_p, tb),)
    vmem_limit = int(min(max(weight_bytes + tb * per_row + (8 << 20), 32 << 20),
                         limit_cap))

    out = pl.pallas_call(
        gated_fusion_kernel,
        out_shape=jax.ShapeDtypeStruct((B_p, H), jnp.float32),
        grid=grid,
        in_specs=[
            pl.BlockSpec(memory_space=pltpu.MemorySpace.SMEM),   # alphas (2,)
            pl.BlockSpec((tb, Fd), lambda i: (i, 0)),            # flow tile (orig dtype)
            pl.BlockSpec((tb, Pd), lambda i: (i, 0)),            # pkt tile (orig dtype)
            pl.BlockSpec((1, Fd), lambda i: (0, 0)),             # w_sf   (resident)
            pl.BlockSpec((1, Pd), lambda i: (0, 0)),             # w_sp   (resident)
            pl.BlockSpec((Fd, H), lambda i: (0, 0)),             # W_fus flow rows (bf16)
            pl.BlockSpec((Pd, H), lambda i: (0, 0)),             # W_fus pkt rows  (bf16)
            pl.BlockSpec((1, H), lambda i: (0, 0)),              # b_fus  (resident)
        ],
        out_specs=pl.BlockSpec((tb, H), lambda i: (i, 0)),
        compiler_params=pltpu.CompilerParams(
            dimension_semantics=("parallel",),
            vmem_limit_bytes=vmem_limit,
        ),
    )(prepared["alphas"], flow, pkt, prepared["w_sf"], prepared["w_sp"],
      prepared["W_fus_flow"], prepared["W_fus_pkt"], prepared["b_fus"])

    return out[:B] if B_p != B else out


def init_params(key, flow_dim, pkt_dim, hidden_dim):
    # torch-layout parameters (nn.Linear stores weight as [out_features, in_features]).
    k1, k2, k3, k4 = jax.random.split(key, 4)
    return {
        "similarity_fc_flow.weight": 0.1 * jax.random.normal(k1, (1, flow_dim), jnp.float32),
        "similarity_fc_pkt.weight": 0.1 * jax.random.normal(k2, (1, pkt_dim), jnp.float32),
        "fusion_fc.weight": 0.1 * jax.random.normal(k3, (hidden_dim, flow_dim + pkt_dim),
                                                    jnp.float32),
        "fusion_fc.bias": 0.1 * jax.random.normal(k4, (hidden_dim,), jnp.float32),
        "alpha_flow": jnp.float32(0.1),
        "alpha_pkt": jnp.float32(0.1),
        # prefusion_fc.* omitted: its output F is dead code in the torch forward.
    }


def reference_jax(flow, pkt, params):
    # Direct transcription of the torch forward (including its epsilons).
    s_f = flow @ params["similarity_fc_flow.weight"].T
    s_p = pkt @ params["similarity_fc_pkt.weight"].T
    e_f, e_p = jnp.exp(s_f), jnp.exp(s_p)
    denom = e_f + e_p + 1e-10
    i_f, i_p = e_f / denom, e_p / denom
    eps = 1e-10
    flow_adj = flow * (1 + params["alpha_flow"] * jnp.log(i_f + eps))
    pkt_adj = pkt * (1 + params["alpha_pkt"] * jnp.log(i_p + eps))
    combined = jnp.concatenate([flow_adj, pkt_adj], axis=1)
    return combined @ params["fusion_fc.weight"].T + params["fusion_fc.bias"]


if __name__ == "__main__":
    key = jax.random.PRNGKey(0)

    # Test 1: module-spec shapes (small dims below lane width, single batch tile).
    B, flow_dim, pkt_dim, hidden_dim = 4, 16, 16, 32
    k_flow, k_pkt, k_param, key = jax.random.split(key, 4)
    flow = jax.random.normal(k_flow, (B, flow_dim), jnp.float32)
    pkt = jax.random.normal(k_pkt, (B, pkt_dim), jnp.float32)
    params = init_params(k_param, flow_dim, pkt_dim, hidden_dim)
    prepared = prepare_params(params, flow_dim)

    out = jax.block_until_ready(gated_activation_fusion(flow, pkt, prepared))
    ref = jax.block_until_ready(reference_jax(flow, pkt, params))
    # bf16-on-MXU path (f32 accumulation) vs f32 reference -> loosened tolerance.
    np.testing.assert_allclose(np.asarray(out), np.asarray(ref), rtol=2e-2, atol=2e-2)

    # Test 2: uneven shapes + forced small batch tile -> multi-step grid, batch padding,
    # and the resident-weight (constant index_map) path.
    B2, fd2, pd2, hd2 = 20, 24, 40, 48
    k_flow, k_pkt, k_param, key = jax.random.split(key, 4)
    flow2 = jax.random.normal(k_flow, (B2, fd2), jnp.float32)
    pkt2 = jax.random.normal(k_pkt, (B2, pd2), jnp.float32)
    params2 = init_params(k_param, fd2, pd2, hd2)
    prepared2 = prepare_params(params2, fd2)

    out2 = jax.block_until_ready(gated_activation_fusion(flow2, pkt2, prepared2, max_tb=8))
    ref2 = jax.block_until_ready(reference_jax(flow2, pkt2, params2))
    np.testing.assert_allclose(np.asarray(out2), np.asarray(ref2), rtol=2e-2, atol=2e-2)

    print("KERNEL_OK")
</pallas_src>

<mosaic_0001>
module attributes {stable_mosaic.version = 11 : i64} {
  func.func @gated_fusion_kernel(%arg0: i32, %arg1: memref<2xf32, #tpu.memory_space<smem>>, %arg2: memref<8x16xf32, #tpu.memory_space<vmem>>, %arg3: memref<8x16xf32, #tpu.memory_space<vmem>>, %arg4: memref<1x16xf32, #tpu.memory_space<vmem>>, %arg5: memref<1x16xf32, #tpu.memory_space<vmem>>, %arg6: memref<16x32xbf16, #tpu.memory_space<vmem>>, %arg7: memref<16x32xbf16, #tpu.memory_space<vmem>>, %arg8: memref<1x32xf32, #tpu.memory_space<vmem>>, %arg9: memref<8x32xf32, #tpu.memory_space<vmem>>) attributes {dimension_semantics = [#tpu.dimension_semantics<parallel>], iteration_bounds = array<i64: 1>, scalar_prefetch = 0 : i64, scratch_operands = 0 : i64, tpu.core_type = #tpu.core_type<tc>, window_params = [{transform_indices = @transform_0, window_bounds = array<i64: 2>}, {transform_indices = @transform_1, window_bounds = array<i64: 8, 16>}, {transform_indices = @transform_2, window_bounds = array<i64: 8, 16>}, {pipeline_mode = #tpu.pipeline_mode<synchronous>, transform_indices = @transform_3, window_bounds = array<i64: 1, 16>}, {pipeline_mode = #tpu.pipeline_mode<synchronous>, transform_indices = @transform_4, window_bounds = array<i64: 1, 16>}, {pipeline_mode = #tpu.pipeline_mode<synchronous>, transform_indices = @transform_5, window_bounds = array<i64: 16, 32>}, {pipeline_mode = #tpu.pipeline_mode<synchronous>, transform_indices = @transform_6, window_bounds = array<i64: 16, 32>}, {pipeline_mode = #tpu.pipeline_mode<synchronous>, transform_indices = @transform_7, window_bounds = array<i64: 1, 32>}, {transform_indices = @transform_8, window_bounds = array<i64: 8, 32>}]} {
    %c0 = arith.constant 0 : index
    %c0_0 = arith.constant 0 : index
    %0 = vector.load %arg2[%c0, %c0_0] : memref<8x16xf32, #tpu.memory_space<vmem>>, vector<8x16xf32>
    %c0_1 = arith.constant 0 : index
    %c0_2 = arith.constant 0 : index
    %1 = vector.load %arg3[%c0_1, %c0_2] : memref<8x16xf32, #tpu.memory_space<vmem>>, vector<8x16xf32>
    %c0_3 = arith.constant 0 : index
    %c0_4 = arith.constant 0 : index
    %2 = vector.load %arg4[%c0_3, %c0_4] : memref<1x16xf32, #tpu.memory_space<vmem>>, vector<1x16xf32>
    %3 = vector.broadcast %2 : vector<1x16xf32> to vector<8x16xf32>
    %4 = arith.mulf %0, %3 : vector<8x16xf32>
    %cst = arith.constant dense<0.000000e+00> : vector<8xf32>
    %5 = vector.multi_reduction <add>, %4, %cst [1] : vector<8x16xf32> to vector<8xf32>
    %6 = vector.shape_cast %5 : vector<8xf32> to vector<8x1xf32>
    %c0_5 = arith.constant 0 : index
    %c0_6 = arith.constant 0 : index
    %7 = vector.load %arg5[%c0_5, %c0_6] : memref<1x16xf32, #tpu.memory_space<vmem>>, vector<1x16xf32>
    %8 = vector.broadcast %7 : vector<1x16xf32> to vector<8x16xf32>
    %9 = arith.mulf %1, %8 : vector<8x16xf32>
    %cst_7 = arith.constant dense<0.000000e+00> : vector<8xf32>
    %10 = vector.multi_reduction <add>, %9, %cst_7 [1] : vector<8x16xf32> to vector<8xf32>
    %11 = vector.shape_cast %10 : vector<8xf32> to vector<8x1xf32>
    %12 = arith.maximumf %6, %11 : vector<8x1xf32>
    %13 = arith.subf %6, %12 : vector<8x1xf32>
    %14 = math.exp %13 : vector<8x1xf32>
    %15 = arith.subf %11, %12 : vector<8x1xf32>
    %16 = math.exp %15 : vector<8x1xf32>
    %17 = arith.addf %14, %16 : vector<8x1xf32>
    %18 = math.log %17 : vector<8x1xf32>
    %19 = arith.addf %12, %18 : vector<8x1xf32>
    %20 = arith.subf %6, %19 : vector<8x1xf32>
    %cst_8 = arith.constant -23.0258503 : f32
    %21 = vector.broadcast %cst_8 : f32 to vector<8x1xf32>
    %22 = arith.maximumf %20, %21 : vector<8x1xf32>
    %23 = arith.subf %11, %19 : vector<8x1xf32>
    %cst_9 = arith.constant -23.0258503 : f32
    %24 = vector.broadcast %cst_9 : f32 to vector<8x1xf32>
    %25 = arith.maximumf %23, %24 : vector<8x1xf32>
    %c0_10 = arith.constant 0 : index
    %26 = memref.load %arg1[%c0_10] : memref<2xf32, #tpu.memory_space<smem>>
    %c1 = arith.constant 1 : index
    %27 = memref.load %arg1[%c1] : memref<2xf32, #tpu.memory_space<smem>>
    %28 = vector.broadcast %26 : f32 to vector<8x1xf32>
    %29 = arith.mulf %28, %22 : vector<8x1xf32>
    %cst_11 = arith.constant 1.000000e+00 : f32
    %30 = vector.broadcast %cst_11 : f32 to vector<8x1xf32>
    %31 = arith.addf %30, %29 : vector<8x1xf32>
    %32 = vector.broadcast %31 : vector<8x1xf32> to vector<8x16xf32>
    %33 = arith.mulf %0, %32 : vector<8x16xf32>
    %34 = vector.broadcast %27 : f32 to vector<8x1xf32>
    %35 = arith.mulf %34, %25 : vector<8x1xf32>
    %cst_12 = arith.constant 1.000000e+00 : f32
    %36 = vector.broadcast %cst_12 : f32 to vector<8x1xf32>
    %37 = arith.addf %36, %35 : vector<8x1xf32>
    %38 = vector.broadcast %37 : vector<8x1xf32> to vector<8x16xf32>
    %39 = arith.mulf %1, %38 : vector<8x16xf32>
    %40 = arith.truncf %33 : vector<8x16xf32> to vector<8x16xbf16>
    %c0_13 = arith.constant 0 : index
    %c0_14 = arith.constant 0 : index
    %41 = vector.load %arg6[%c0_13, %c0_14] : memref<16x32xbf16, #tpu.memory_space<vmem>>, vector<16x32xbf16>
    %cst_15 = arith.constant dense<0.000000e+00> : vector<8x32xf32>
    %42 = tpu.matmul %40, %41, %cst_15 {dimension_numbers = #tpu.dot_dimension_numbers<[1], [0], [0], [1], [0, 0, 1, 1], [], []>} : vector<8x16xbf16>, vector<16x32xbf16>, vector<8x32xf32> -> vector<8x32xf32>
    %43 = arith.truncf %39 : vector<8x16xf32> to vector<8x16xbf16>
    %c0_16 = arith.constant 0 : index
    %c0_17 = arith.constant 0 : index
    %44 = vector.load %arg7[%c0_16, %c0_17] : memref<16x32xbf16, #tpu.memory_space<vmem>>, vector<16x32xbf16>
    %cst_18 = arith.constant dense<0.000000e+00> : vector<8x32xf32>
    %45 = tpu.matmul %43, %44, %cst_18 {dimension_numbers = #tpu.dot_dimension_numbers<[1], [0], [0], [1], [0, 0, 1, 1], [], []>} : vector<8x16xbf16>, vector<16x32xbf16>, vector<8x32xf32> -> vector<8x32xf32>
    %46 = arith.addf %42, %45 : vector<8x32xf32>
    %c0_19 = arith.constant 0 : index
    %c0_20 = arith.constant 0 : index
    %47 = vector.load %arg8[%c0_19, %c0_20] : memref<1x32xf32, #tpu.memory_space<vmem>>, vector<1x32xf32>
    %48 = vector.broadcast %47 : vector<1x32xf32> to vector<8x32xf32>
    %49 = arith.addf %46, %48 : vector<8x32xf32>
    %c0_21 = arith.constant 0 : index
    %c0_22 = arith.constant 0 : index
    %50 = vector.load %arg9[%c0_21, %c0_22] : memref<8x32xf32, #tpu.memory_space<vmem>>, vector<8x32xf32>
    tpu.vector_store %arg9[%c0_21, %c0_22], %49 {strides = array<i32>} : memref<8x32xf32, #tpu.memory_space<vmem>>, vector<8x32xf32>,
    return
  }
  func.func @transform_0(%arg0: i32) -> i32 {
    %c0_i32 = arith.constant 0 : i32
    %c0_i32_0 = arith.constant 0 : i32
    return %c0_i32 : i32
  }
  func.func @transform_1(%arg0: i32) -> (i32, i32) {
    %c0_i32 = arith.constant 0 : i32
    %c0_i32_0 = arith.constant 0 : i32
    return %arg0, %c0_i32 : i32, i32
  }
  func.func @transform_2(%arg0: i32) -> (i32, i32) {
    %c0_i32 = arith.constant 0 : i32
    %c0_i32_0 = arith.constant 0 : i32
    return %arg0, %c0_i32 : i32, i32
  }
  func.func @transform_3(%arg0: i32) -> (i32, i32) {
    %c0_i32 = arith.constant 0 : i32
    %c0_i32_0 = arith.constant 0 : i32
    %c0_i32_1 = arith.constant 0 : i32
    return %c0_i32, %c0_i32_0 : i32, i32
  }
  func.func @transform_4(%arg0: i32) -> (i32, i32) {
    %c0_i32 = arith.constant 0 : i32
    %c0_i32_0 = arith.constant 0 : i32
    %c0_i32_1 = arith.constant 0 : i32
    return %c0_i32, %c0_i32_0 : i32, i32
  }
  func.func @transform_5(%arg0: i32) -> (i32, i32) {
    %c0_i32 = arith.constant 0 : i32
    %c0_i32_0 = arith.constant 0 : i32
    %c0_i32_1 = arith.constant 0 : i32
    return %c0_i32, %c0_i32_0 : i32, i32
  }
  func.func @transform_6(%arg0: i32) -> (i32, i32) {
    %c0_i32 = arith.constant 0 : i32
    %c0_i32_0 = arith.constant 0 : i32
    %c0_i32_1 = arith.constant 0 : i32
    return %c0_i32, %c0_i32_0 : i32, i32
  }
  func.func @transform_7(%arg0: i32) -> (i32, i32) {
    %c0_i32 = arith.constant 0 : i32
    %c0_i32_0 = arith.constant 0 : i32
    %c0_i32_1 = arith.constant 0 : i32
    return %c0_i32, %c0_i32_0 : i32, i32
  }
  func.func @transform_8(%arg0: i32) -> (i32, i32) {
    %c0_i32 = arith.constant 0 : i32
    %c0_i32_0 = arith.constant 0 : i32
    return %arg0, %c0_i32 : i32, i32
  }
}

</mosaic_0001>

<bundles_post_ra>
// kernel: tpu_custom_call.1
= control target key start
LH: loop header
LB: loop body
LE: loop exit
PB: predicated region body
PF: predicated region fallthrough
CT: control target
= control target key end

     0   :  { %13 = vsyncpa [#allocation5], 0  ;;  %s519_s0 = inlined_call_operand.hbm [shape: f32[2], index: 0, kind: input, shape index: {}]   ;;  %s520_s1 = inlined_call_operand.hbm [shape: f32[8,16], index: 1, kind: input, shape index: {}]   ;;  %s521_s2 = inlined_call_operand.hbm [shape: f32[8,16], index: 2, kind: input, shape index: {}]   ;;  %s522_s3 = inlined_call_operand.vmem [shape: f32[1,16], index: 3, kind: input, shape index: {}]   ;;  %s523_s4 = inlined_call_operand.hbm [shape: f32[1,16], index: 4, kind: input, shape index: {}]   ;;  %s524_s5 = inlined_call_operand.vmem [shape: bf16[16,32], index: 5, kind: input, shape index: {}]   ;;  %s525_s6 = inlined_call_operand.hbm [shape: bf16[16,32], index: 6, kind: input, shape index: {}]   ;;  %s526_s7 = inlined_call_operand.vmem [shape: f32[1,32], index: 7, kind: input, shape index: {}]   ;;  %s527_s8 = inlined_call_operand.hbm [shape: f32[8,32], index: 8, kind: output, shape index: {}]  }
   0x1   :  { %14 = vsyncpa [#allocation3], 0 }
   0x2   :  { %15 = vsyncpa [#allocation8], 0 }
   0x3   :  { %16 = vsyncpa [#allocation11], 0 }
   0x4   :  { %17 = vsyncpa [#allocation4], 0  ;;  %s433_s27 = smov [#allocation7]   ;;  %s434_s29 = smov [#allocation6]  }
   0x5   :  { %s42_s28 = sshll.u32 %s433_s27, 4  ;;  %s32_s30 = sshll.u32 %s434_s29, 4  ;;  %s43_s28 = int_to_ptr.vmem [resolvable:$true] %s42_s28  ;;  %s33_s30 = int_to_ptr.vmem [resolvable:$true] %s32_s30 }
   0x6   :  { %s323_s9 = scalar_lea.vmem %s43_s28, 128  ;;  %p328_p1 = scmp.lt.s32.totalorder %s43_s28, %s43_s28 }
   0x7   :  { %p324_p0 = scmp.ne.s32.totalorder %s43_s28, %s323_s9  ;;  %p329_p2 = scmp.lt.s32.totalorder %s323_s9, %s323_s9 }
   0x9   :  { %p330_p3 = por %p329_p2, %p328_p1 }
   0xb   :  { %p331_p4 = pnand %p330_p3, %p324_p0 }
   0xd   :  { %334 = shalt.err (!%p331_p4)
}
   0xe   :  { %45 = dma.hbm_to_vmem [thread:$0]  %s521_s2, 128, %s43_s28, [#allocation8]  }
   0xf   :  { %s435_s12 = smov [#allocation2]   ;;  %s351_s15 = scalar_lea.vmem %s33_s30, 128 }
  0x10   :  { %25 = dma.hbm_to_smem %s519_s0, 16, %s435_s12, [#allocation5]  }
  0x11   :  { %p352_p5 = scmp.ne.s32.totalorder %s33_s30, %s351_s15  ;;  %p356_p6 = scmp.lt.s32.totalorder %s33_s30, %s33_s30 }
  0x12   :  { %p357_p7 = scmp.lt.s32.totalorder %s351_s15, %s351_s15 }
  0x14   :  { %p358_p8 = por %p357_p7, %p356_p6 }
  0x16   :  { %p359_p9 = pnand %p358_p8, %p352_p5 }
  0x18   :  { %362 = shalt.err (!%p359_p9)
}
  0x19   :  { %35 = dma.hbm_to_vmem [thread:$0]  %s520_s1, 128, %s33_s30, [#allocation3]  }
  0x1a   :  { %s436_s18 = smov [#allocation9]   ;;  %s437_s2 = smov [#allocation10]  }
  0x1b   :  { %s54_s19 = sshll.u32 %s436_s18, 4  ;;  %s65_s20 = sshll.u32 %s437_s2, 4  ;;  %s55_s19 = int_to_ptr.vmem [resolvable:$true] %s54_s19  ;;  %s66_s20 = int_to_ptr.vmem [resolvable:$true] %s65_s20 }
  0x1c   :  { %s371_s21 = scalar_lea.vmem %s55_s19, 16  ;;  %s375_s0 = scalar_lea.vmem %s55_s19, 32 }
  0x1d   :  { %p372_p10 = scmp.ne.s32.totalorder %s55_s19, %s371_s21  ;;  %p376_p11 = scmp.lt.s32.totalorder %s55_s19, %s55_s19 }
  0x1e   :  { %p377_p12 = scmp.lt.s32.totalorder %s375_s0, %s371_s21 }
  0x20   :  { %p378_p13 = por %p377_p12, %p376_p11 }
  0x22   :  { %p379_p0 = pnand %p378_p13, %p372_p10 }
  0x24   :  { %382 = shalt.err (!%p379_p0)
}
  0x25   :  { %57 = dma.hbm_to_vmem [thread:$0]  %s523_s4, 16, %s55_s19, [#allocation8]  }
  0x26   :  { %s391_s24 = scalar_lea.vmem %s66_s20, 128  ;;  %p396_p2 = scmp.lt.s32.totalorder %s66_s20, %s66_s20 }
  0x27   :  { %p392_p1 = scmp.ne.s32.totalorder %s66_s20, %s391_s24  ;;  %p397_p3 = scmp.lt.s32.totalorder %s391_s24, %s391_s24 }
  0x29   :  { %p398_p4 = por %p397_p3, %p396_p2 }
  0x2b   :  { %p399_p5 = pnand %p398_p4, %p392_p1 }
  0x2d   :  { %402 = shalt.err (!%p399_p5)
}
  0x2e   :  { %s438_s1 = smov 64   ;;  %s439_s25 = smov 4  }
  0x2f   :  { %71 = dma.hbm_to_vmem [thread:$0]  %s525_s6, 128, %s66_s20, [#allocation11], %s438_s1, %s438_s1, %s439_s25  }
  0x30   :  { %423 = dma.done.wait [#allocation5], 16  }
  0x31   :  { %424 = vsyncadd [#allocation5], 4294967280 }
  0x32   :  { %425 = dma.done.wait [#allocation3], 128  }
  0x33   :  { %426 = vsyncadd [#allocation3], 4294967168 }
  0x34   :  { %427 = dma.done.wait [#allocation8], 144  }
  0x35   :  { %428 = vsyncadd [#allocation8], 4294967152 }
  0x36   :  { %429 = dma.done.wait [#allocation11], 128  }
  0x37   :  { %430 = vsyncadd [#allocation11], 4294967168 }
  0x38   :  { %89 = sfence }
  0x39   :  { %v91_v0 = vld [vmem:[#allocation6] sm:$0xff]  ;;  %v273_v1 = vld [vmem:[%s522_s3] ss:$0 sm:$0xff]  ;;  %vm101_vm0 = vcmask 130048   ;;  %v92_v2 = vld [vmem:[#allocation7] sm:$0xff]  ;;  %v440_v10 = vmov 0.0  }
  0x3a   :  { %v100_v3 = vmul.f32 %v273_v1, %v91_v0  ;;  %v274_v4 = vld [vmem:[#allocation9] ss:$0 sm:$0xff]  ;;  %v307_v8 = vld [vmem:[#allocation10] sm:$0xff]   ;;  %285 = vmatprep.subr.bf16.mxu0 %v440_v10  ;;  %291 = vmatprep.subr.bf16.mxu1 %v440_v10  ;;  %vm441_vm1 = vmmov 0   ;;  %s131_s3 = sld [smem:[#allocation2]]  ;;  %s442_s10 = smov [#allocation12]  }
  0x3b   :  { %v112_v5 = vmul.f32 %v274_v4, %v92_v2  ;;  %v308_v9 = vld [vmem:[%s524_s5] sm:$0xff]   ;;  %286 = vmatpush3.bf16.msra.mxu0 %v307_v8  ;;  %287 = vmatprep.mubr.msk.bf16.mxu0 %vm441_vm1, %v440_v10  ;;  %s275_s5 = sld [smem:[#allocation2 + $0x1]]  ;;  %s261_s11 = sshll.u32 %s442_s10, 4  ;;  %vm253_vm2 = vcmask 261120   ;;  %s262_s11 = int_to_ptr.vmem [resolvable:$true] %s261_s11 }
  0x3c   :  { %v102_v6 = vsel %vm101_vm0, %v100_v3, 0.0  ;;  %292 = vmatpush3.bf16.msra.mxu1 %v308_v9  ;;  %293 = vmatprep.mubr.msk.bf16.mxu1 %vm441_vm1, %v440_v10  ;;  %v280_v40 = vld [vmem:[%s526_s7] ss:$0 sm:$0xff]  ;;  %s403_s12 = scalar_lea.vmem %s262_s11, 128  ;;  %p408_p7 = scmp.lt.s32.totalorder %s262_s11, %s262_s11 }
  0x3d   :  { %103 = vadd.xlane.f32.xlu0 %v102_v6  ;;  %v113_v7 = vsel %vm101_vm0, %v112_v5, 0.0  ;;  %p404_p6 = scmp.ne.s32.totalorder %s262_s11, %s403_s12  ;;  %p409_p8 = scmp.lt.s32.totalorder %s403_s12, %s403_s12 }
  0x3f   :  { %p410_p9 = por %p409_p8, %p408_p7 }
  0x40   :  { %v133_v26 = vstv %s131_s3 }
  0x41   :  { %114 = vadd.xlane.f32.xlu0 %v113_v7  ;;  %v137_v27 = vstv %s275_s5  ;;  %p411_p10 = pnand %p410_p9, %p404_p6 }
  0xc6   :  { %v104_v11 = vpop.xlane.xlu0 %103 }
  0xca   :  { %v115_v12 = vpop.xlane.xlu0 %114 }
  0xcb   :  { %v116_v13 = vmax.f32 %v104_v11, %v115_v12 }
  0xcd   :  { %v117_v14 = vsub.f32 %v104_v11, %v116_v13  ;;  %v120_v15 = vsub.f32 %v115_v12, %v116_v13 }
  0xcf   :  { %v118_v16 = vmul.f32 1.442695, %v117_v14  ;;  %v121_v17 = vmul.f32 1.442695, %v120_v15 }
  0xd1   :  { %309 = vpow2.f32 %v118_v16 }
  0xd2   :  { %311 = vpow2.f32 %v121_v17 }
  0xde   :  { %v310_v18 = vpop.eup %309 }
  0xdf   :  { %v312_v19 = vpop.eup %311 }
  0xe0   :  { %v123_v20 = vadd.f32 %v312_v19, %v310_v18 }
  0xe2   :  { %313 = vlog2.f32 %v123_v20 }
  0xef   :  { %v314_v21 = vpop.eup %313 }
  0xf0   :  { %v125_v22 = vmul.f32 0.6931472, %v314_v21 }
  0xf2   :  { %v126_v23 = vadd.f32 %v125_v22, %v116_v13 }
  0xf4   :  { %v127_v24 = vsub.f32 %v104_v11, %v126_v23  ;;  %v129_v25 = vsub.f32 %v115_v12, %v126_v23 }
  0xf6   :  { %v128_v28 = vmax.f32 %v127_v24, -23.02585  ;;  %v130_v29 = vmax.f32 %v129_v25, -23.02585 }
  0xf8   :  { %v134_v30 = vmul.f32 %v133_v26, %v128_v28  ;;  %v138_v31 = vmul.f32 %v137_v27, %v130_v29 }
  0xfa   :  { %v135_v32 = vadd.f32 1.0, %v134_v30  ;;  %v139_v33 = vadd.f32 1.0, %v138_v31 }
  0xfc   :  { %v140_v34 = vmul.f32 %v139_v33, %v92_v2  ;;  %v136_v35 = vmul.f32 %v135_v32, %v91_v0 }
  0xfe   :  { %v144_v36 = vpack.c.bf16 %v140_v34, %v140_v34  ;;  %v141_v37 = vpack.c.bf16 %v136_v35, %v136_v35 }
 0x100   :  { %288 = vmatmul.mubr.msk.bf16.vlgmr.msra.gmra.mxu0 %vm101_vm0, %v144_v36  ;;  %294 = vmatmul.mubr.msk.bf16.vlgmr.msra.gmra.mxu1 %vm101_vm0, %v141_v37 }
 0x1c0   :  { %v190_v38 = vpop.f32.mrf.mxu0  ;;  %v239_v39 = vpop.f32.mrf.mxu1 }
 0x1c1   :  { %v240_v41 = vadd.f32 %v239_v39, %v190_v38 }
 0x1c2   :  { %v289_v42 = vpop.f32.mrf.mxu0  ;;  %v295_v43 = vpop.f32.mrf.mxu1 }
 0x1c3   :  { %v252_v44 = vadd.f32 %v280_v40, %v240_v41 }
 0x1c4   :  { %v193_v45 = vpop.f32.mrf.mxu0  ;;  %v242_v46 = vpop.f32.mrf.mxu1 }
 0x1c5   :  { %254 = vst.msk [vmem:[#allocation12] sm:$0xff] %vm253_vm2, %v252_v44 }
 0x1c6   :  { %v290_v47 = vpop.f32.mrf.mxu0  ;;  %v296_v48 = vpop.f32.mrf.mxu1 }
 0x1c7   :  { %414 = shalt.err (!%p411_p10)
}
 0x1c8   :  { %264 = dma.vmem_to_hbm [thread:$0]  %s262_s11, 128, %s527_s8, [#allocation4]  }
 0x1c9   :  { %431 = dma.done.wait [#allocation4], 128  }
 0x1ca   :  { %432 = vsyncadd [#allocation4], 4294967168 }
 0x1cb   :  { %268 = vsyncpa [#allocation3], 1 }
 0x1cc   :  { %269 = vsyncpa [#allocation8], 1 }
 0x1cd   :  { %270 = vsyncpa [#allocation11], 1 }
 0x1ce   :  { %271 = vsyncpa [#allocation4], 1 }
 0x1cf   :  { %272 = vsyncpa [#allocation5], 1 }

</bundles_post_ra>
